<compile_context>
chip_gen: v5e
topology: v5e:2x2
jax: 0.10.0
libtpu: 0.0.40
codegen_flags: <defaults>
</compile_context>

<pallas_src>
import math

import jax
import jax.numpy as jnp
import numpy as np
from jax.experimental import pallas as pl
from jax.experimental.pallas import tpu as pltpu


def _adaptive_pool_matrix(in_size: int, out_size: int) -> np.ndarray:
    """Row-stochastic (out_size, in_size) matrix implementing 1-D adaptive avg pool."""
    w = np.zeros((out_size, in_size), dtype=np.float32)
    for o in range(out_size):
        start = (o * in_size) // out_size                 # floor(o * H / OH)
        end = math.ceil((o + 1) * in_size / out_size)     # ceil((o+1) * H / OH)
        w[o, start:end] = 1.0 / (end - start)
    return w


def _vmem_capacity_bytes() -> int:
    """Per-TensorCore VMEM capacity; conservative (v7x) fallback if unknown."""
    try:
        return int(pltpu.get_tpu_info().vmem_capacity_bytes)
    except Exception:
        return 64 << 20


def _sublane_multiple(itemsize: int) -> int:
    """Native sublane packing: 8 rows for 32-bit, 16 for bf16, 32 for int8/fp8."""
    return max(8, 32 // max(itemsize, 1))


def _pick_row_tile(n_rows: int, k: int, n_cols: int,
                   in_itemsize: int, out_itemsize: int,
                   in_budget_bytes: int) -> int:
    """Largest sublane-aligned row tile whose double-buffered in+out blocks fit
    the VMEM budget, clamped so big problems still get >= 8 grid steps."""
    sub = _sublane_multiple(in_itemsize)
    if n_rows <= sub:
        return n_rows                              # full rows => always-legal block

    # double-buffered input + output bytes per row of the tile
    per_row = 2 * k * in_itemsize + 2 * n_cols * out_itemsize
    tm = in_budget_bytes // max(per_row, 1)

    # keep >= ~8 grid steps when the problem is big enough (pipelining + megacore)
    min_steps = 8
    cap = max(sub, ((n_rows // min_steps) // sub) * sub)
    tm = min(tm, cap)

    tm = max(sub, (tm // sub) * sub)               # dtype-aligned sublane multiple
    return min(tm, n_rows)


def _row_matmul_kernel(x_ref, m_ref, o_ref):
    # x_ref : (TM, K)   m_ref : (K, N) f32   o_ref : (TM, N)
    x = x_ref[...]
    if not jnp.issubdtype(x.dtype, jnp.floating):
        x = x.astype(jnp.float32)
    # Single MXU contraction, K large (H*W or W/H), M = row tile, N = output bins.
    y = jnp.dot(x, m_ref[...], preferred_element_type=jnp.float32)
    o_ref[...] = y.astype(o_ref.dtype)


def _row_matmul(rows: jax.Array, mat: jax.Array, out_dtype) -> jax.Array:
    """(R, K) @ (K, N) with rows tiled along R; mat stays resident across grid."""
    r, k = rows.shape
    k2, n = mat.shape
    assert k == k2, (k, k2)

    in_itemsize = jnp.dtype(rows.dtype).itemsize
    out_itemsize = jnp.dtype(out_dtype).itemsize

    vmem_cap = _vmem_capacity_bytes()
    # ~16 MiB block budget on 64 MiB chips (v7x), ~32 MiB on 128 MiB chips (v5e/v6e).
    in_budget = int(min(max(vmem_cap // 4, 8 << 20), 32 << 20))
    limit_cap = (40 << 20) if vmem_cap <= (64 << 20) else (64 << 20)

    tm = _pick_row_tile(r, k, n, in_itemsize, out_itemsize, in_budget)
    grid = (pl.cdiv(r, tm),)

    # Scoped VMEM: double-buffered input and output blocks + BOTH buffers of the
    # resident pooling matrix (Pallas double-buffers it even though its block
    # index never changes) + headroom for internal scratch.
    blk_in = tm * k * in_itemsize
    blk_out = tm * n * out_itemsize
    mat_bytes = k * n * 4
    vmem_limit = int(min(
        max(2 * blk_in + 2 * blk_out + 2 * mat_bytes + (4 << 20), 16 << 20),
        limit_cap))

    cost = pl.CostEstimate(
        flops=int(2.0 * r * k * n),
        transcendentals=0,
        bytes_accessed=int(r * k * in_itemsize + mat_bytes + r * n * out_itemsize),
    )

    return pl.pallas_call(
        _row_matmul_kernel,
        out_shape=jax.ShapeDtypeStruct((r, n), out_dtype),
        grid_spec=pltpu.PrefetchScalarGridSpec(
            num_scalar_prefetch=0,
            grid=grid,
            in_specs=[
                pl.BlockSpec((tm, k), lambda i: (i, 0)),
                pl.BlockSpec((k, n), lambda i: (0, 0)),   # resident across grid
            ],
            out_specs=pl.BlockSpec((tm, n), lambda i: (i, 0)),
        ),
        compiler_params=pltpu.CompilerParams(
            dimension_semantics=("parallel",),
            vmem_limit_bytes=vmem_limit,
        ),
        cost_estimate=cost,
    )(rows, mat)


# Above this, the fused kron matrix is too big (VMEM / FLOP blow-up); use the
# factored two-matmul path instead.
_KRON_MAX_BYTES = 2 << 20


def adaptive_average_pooling(x: jax.Array, oup: int) -> jax.Array:
    """Pallas equivalent of AveragePooling(oup).forward(x, c_m) (c_m is unused)."""
    n, c, h, w = x.shape
    oh = ow = int(oup)
    hw, ohow = h * w, oh * ow

    wh = _adaptive_pool_matrix(h, oh)            # (OH, H)
    ww = _adaptive_pool_matrix(w, ow)            # (OW, W)

    if hw * ohow * 4 <= _KRON_MAX_BYTES:
        # Fused path: y_flat = x_flat @ kron(Wh, Ww)^T, one big-K MXU matmul.
        kt = jnp.asarray(np.kron(wh, ww).T)      # (H*W, OH*OW), float32
        rows = x.reshape(n * c, hw)              # free row-major view in HBM
        out_flat = _row_matmul(rows, kt, x.dtype)
        return out_flat.reshape(n, c, oh, ow)

    # Factored path for large outputs: pool along W, then along H, reusing the
    # same row-matmul kernel.  Intermediate kept in f32 for accuracy; the
    # wrapper transposes are plain XLA layout plumbing.
    ww_t = jnp.asarray(ww.T)                     # (W, OW)
    wh_t = jnp.asarray(wh.T)                     # (H, OH)
    y1 = _row_matmul(x.reshape(n * c * h, w), ww_t, jnp.float32)   # (N*C*H, OW)
    y1 = y1.reshape(n * c, h, ow).transpose(0, 2, 1).reshape(n * c * ow, h)
    y2 = _row_matmul(y1, wh_t, x.dtype)                            # (N*C*OW, OH)
    return y2.reshape(n, c, ow, oh).transpose(0, 1, 3, 2)


def _reference_adaptive_avg_pool(x: np.ndarray, oup: int) -> np.ndarray:
    wh = _adaptive_pool_matrix(x.shape[2], oup)
    ww = _adaptive_pool_matrix(x.shape[3], oup)
    return np.einsum("oh,nchw,pw->ncop", wh, x.astype(np.float32), ww)


if __name__ == "__main__":
    key = jax.random.PRNGKey(0)
    N, C, H, W = 2, 4, 16, 16
    OUP = 4  # AdaptiveAvgPool2d(oup) -> output spatial size (4, 4)

    x = jax.random.normal(key, (N, C, H, W), dtype=jnp.float32)
    c_m = None  # unused by the forward pass, kept for signature parity

    y = adaptive_average_pooling(x, OUP)
    y = jax.block_until_ready(y)

    ref = _reference_adaptive_avg_pool(np.asarray(x), OUP)
    assert y.shape == (N, C, OUP, OUP), y.shape
    np.testing.assert_allclose(np.asarray(y), ref, rtol=1e-5, atol=1e-5)

    print("KERNEL_OK")
</pallas_src>

<mosaic_0001>
module attributes {stable_mosaic.version = 11 : i64} {
  func.func @_row_matmul_kernel(%arg0: i32, %arg1: memref<8x256xf32, #tpu.memory_space<vmem>>, %arg2: memref<256x16xf32, #tpu.memory_space<vmem>>, %arg3: memref<8x16xf32, #tpu.memory_space<vmem>>) attributes {dimension_semantics = [#tpu.dimension_semantics<parallel>], iteration_bounds = array<i64: 1>, scalar_prefetch = 0 : i64, scratch_operands = 0 : i64, tpu.core_type = #tpu.core_type<tc>, window_params = [{transform_indices = @transform_0, window_bounds = array<i64: 8, 256>}, {pipeline_mode = #tpu.pipeline_mode<synchronous>, transform_indices = @transform_1, window_bounds = array<i64: 256, 16>}, {transform_indices = @transform_2, window_bounds = array<i64: 8, 16>}]} {
    %c0 = arith.constant 0 : index
    %c0_0 = arith.constant 0 : index
    %0 = vector.load %arg1[%c0, %c0_0] : memref<8x256xf32, #tpu.memory_space<vmem>>, vector<8x256xf32>
    %c0_1 = arith.constant 0 : index
    %c0_2 = arith.constant 0 : index
    %1 = vector.load %arg2[%c0_1, %c0_2] : memref<256x16xf32, #tpu.memory_space<vmem>>, vector<256x16xf32>
    %cst = arith.constant dense<0.000000e+00> : vector<8x16xf32>
    %2 = tpu.matmul %0, %1, %cst {dimension_numbers = #tpu.dot_dimension_numbers<[1], [0], [0], [1], [0, 0, 1, 1], [], []>} : vector<8x256xf32>, vector<256x16xf32>, vector<8x16xf32> -> vector<8x16xf32>
    %c0_3 = arith.constant 0 : index
    %c0_4 = arith.constant 0 : index
    %3 = vector.load %arg3[%c0_3, %c0_4] : memref<8x16xf32, #tpu.memory_space<vmem>>, vector<8x16xf32>
    tpu.vector_store %arg3[%c0_3, %c0_4], %2 {strides = array<i32>} : memref<8x16xf32, #tpu.memory_space<vmem>>, vector<8x16xf32>,
    return
  }
  func.func @transform_0(%arg0: i32) -> (i32, i32) {
    %c0_i32 = arith.constant 0 : i32
    %c0_i32_0 = arith.constant 0 : i32
    return %arg0, %c0_i32 : i32, i32
  }
  func.func @transform_1(%arg0: i32) -> (i32, i32) {
    %c0_i32 = arith.constant 0 : i32
    %c0_i32_0 = arith.constant 0 : i32
    %c0_i32_1 = arith.constant 0 : i32
    return %c0_i32, %c0_i32_0 : i32, i32
  }
  func.func @transform_2(%arg0: i32) -> (i32, i32) {
    %c0_i32 = arith.constant 0 : i32
    %c0_i32_0 = arith.constant 0 : i32
    return %arg0, %c0_i32 : i32, i32
  }
}

</mosaic_0001>

<bundles_post_ra>
// kernel: tpu_custom_call.1
= control target key start
LH: loop header
LB: loop body
LE: loop exit
PB: predicated region body
PF: predicated region fallthrough
CT: control target
= control target key end

     0   :  { %s252_s0 = inlined_call_operand.vmem [shape: f32[8,256], index: 0, kind: input, shape index: {}]   ;;  %s253_s1 = inlined_call_operand.vmem [shape: f32[256,16], index: 1, kind: input, shape index: {}]   ;;  %s254_s2 = inlined_call_operand.hbm [shape: f32[8,16], index: 2, kind: output, shape index: {}]  }
   0x1   :  { %v29_v0 = vld [vmem:[%s253_s1 + $0x78] sm:$0xff]  ;;  %v28_v2 = vld [vmem:[%s253_s1 + $0x70] sm:$0xff]  ;;  %v27_v4 = vld [vmem:[%s253_s1 + $0x68] sm:$0xff] }
   0x2   :  { %v45_v1 = vld [vmem:[%s253_s1 + $0xf8] sm:$0xff]  ;;  %46 = vmatpush.msra.mxu0 %v29_v0  ;;  %v44_v3 = vld [vmem:[%s253_s1 + $0xf0] sm:$0xff]  ;;  %v43_v5 = vld [vmem:[%s253_s1 + $0xe8] sm:$0xff] }
   0x3   :  { %66 = vmatpush.msra.mxu1 %v45_v1  ;;  %v26_v6 = vld [vmem:[%s253_s1 + $0x60] sm:$0xff]  ;;  %v25_v8 = vld [vmem:[%s253_s1 + $0x58] sm:$0xff]  ;;  %v24_v10 = vld [vmem:[%s253_s1 + $0x50] sm:$0xff] }
   0x4   :  { %47 = vmatpush.msra.mxu0 %v28_v2  ;;  %v42_v7 = vld [vmem:[%s253_s1 + $0xe0] sm:$0xff]  ;;  %v41_v9 = vld [vmem:[%s253_s1 + $0xd8] sm:$0xff]  ;;  %v40_v11 = vld [vmem:[%s253_s1 + $0xd0] sm:$0xff] }
   0x5   :  { %67 = vmatpush.msra.mxu1 %v44_v3  ;;  %v23_v12 = vld [vmem:[%s253_s1 + $0x48] sm:$0xff] }
   0x6   :  { %48 = vmatpush.msra.mxu0 %v27_v4  ;;  %v39_v13 = vld [vmem:[%s253_s1 + $0xc8] sm:$0xff] }
   0x7   :  { %68 = vmatpush.msra.mxu1 %v43_v5 }
   0x8   :  { %49 = vmatpush.msra.mxu0 %v26_v6 }
   0x9   :  { %69 = vmatpush.msra.mxu1 %v42_v7 }
   0xa   :  { %50 = vmatpush.msra.mxu0 %v25_v8 }
   0xb   :  { %70 = vmatpush.msra.mxu1 %v41_v9 }
   0xc   :  { %51 = vmatpush.msra.mxu0 %v24_v10 }
   0xd   :  { %71 = vmatpush.msra.mxu1 %v40_v11 }
   0xe   :  { %7 = vsyncpa [#allocation3], 0  ;;  %v22_v14 = vld [vmem:[%s253_s1 + $0x40] sm:$0xff]  ;;  %52 = vmatpush.msra.mxu0 %v23_v12  ;;  %v21_v16 = vld [vmem:[%s253_s1 + $0x38] sm:$0xff]  ;;  %s131_s21 = smov [#allocation2]   ;;  %vm86_vm0 = vcmask 130048  }
   0xf   :  { %v38_v15 = vld [vmem:[%s253_s1 + $0xc0] sm:$0xff]  ;;  %72 = vmatpush.msra.mxu1 %v39_v13  ;;  %v37_v17 = vld [vmem:[%s253_s1 + $0xb8] sm:$0xff]  ;;  %v20_v18 = vld [vmem:[%s253_s1 + $0x30] sm:$0xff]  ;;  %s93_s22 = sshll.u32 %s131_s21, 4  ;;  %s94_s22 = int_to_ptr.vmem [resolvable:$true] %s93_s22 }
  0x10   :  { %53 = vmatpush.msra.mxu0 %v22_v14  ;;  %v36_v19 = vld [vmem:[%s253_s1 + $0xb0] sm:$0xff]  ;;  %v19_v20 = vld [vmem:[%s253_s1 + $0x28] sm:$0xff]  ;;  %v18_v22 = vld [vmem:[%s253_s1 + $0x20] sm:$0xff] }
  0x11   :  { %73 = vmatpush.msra.mxu1 %v38_v15  ;;  %v35_v21 = vld [vmem:[%s253_s1 + $0xa8] sm:$0xff]  ;;  %v34_v23 = vld [vmem:[%s253_s1 + $0xa0] sm:$0xff]  ;;  %v17_v24 = vld [vmem:[%s253_s1 + $0x18] sm:$0xff] }
  0x12   :  { %54 = vmatpush.msra.mxu0 %v21_v16  ;;  %v33_v25 = vld [vmem:[%s253_s1 + $0x98] sm:$0xff]  ;;  %v16_v26 = vld [vmem:[%s253_s1 + $0x10] sm:$0xff]  ;;  %v15_v28 = vld [vmem:[%s253_s1 + $0x8] sm:$0xff] }
  0x13   :  { %74 = vmatpush.msra.mxu1 %v37_v17  ;;  %v32_v27 = vld [vmem:[%s253_s1 + $0x90] sm:$0xff]  ;;  %v31_v29 = vld [vmem:[%s253_s1 + $0x88] sm:$0xff]  ;;  %v14_v30 = vld [vmem:[%s253_s1] sm:$0xff] }
  0x14   :  { %55 = vmatpush.msra.mxu0 %v20_v18  ;;  %v30_v31 = vld [vmem:[%s253_s1 + $0x80] sm:$0xff]  ;;  %v13_v33 = vld [vmem:[%s252_s0 + $0x8] sm:$0xff]  ;;  %s95_s1 = sshll.u32 %s254_s2, 4  ;;  %s96_s1 = int_to_ptr.hbm [resolvable:$true] %s95_s1 }
  0x15   :  { %75 = vmatpush.msra.mxu1 %v36_v19  ;;  %v12_v32 = vld [vmem:[%s252_s0] sm:$0xff] }
  0x16   :  { %56 = vmatpush.msra.mxu0 %v19_v20 }
  0x17   :  { %76 = vmatpush.msra.mxu1 %v35_v21 }
  0x18   :  { %57 = vmatpush.msra.mxu0 %v18_v22 }
  0x19   :  { %77 = vmatpush.msra.mxu1 %v34_v23 }
  0x1a   :  { %58 = vmatpush.msra.mxu0 %v17_v24 }
  0x1b   :  { %78 = vmatpush.msra.mxu1 %v33_v25 }
  0x1c   :  { %59 = vmatpush.msra.mxu0 %v16_v26 }
  0x1d   :  { %79 = vmatpush.msra.mxu1 %v32_v27 }
  0x1e   :  { %60 = vmatpush.msra.mxu0 %v15_v28 }
  0x1f   :  { %80 = vmatpush.msra.mxu1 %v31_v29 }
  0x20   :  { %61 = vmatpush.msra.mxu0 %v14_v30 }
  0x21   :  { %81 = vmatpush.msra.mxu1 %v30_v31  ;;  %62 = vmatmul.f32.vlgmr.msra.gmra.mxu0 %v12_v32 }
  0x22   :  { %82 = vmatmul.f32.vlgmr.msra.gmra.mxu1 %v13_v33 }
  0x9e   :  { %v63_v34 = vpop.f32.mrf.mxu0 }
  0x9f   :  { %v83_v35 = vpop.f32.mrf.mxu1 }
  0xa0   :  { %v84_v36 = vadd.f32 %v83_v35, %v63_v34 }
  0xa2   :  { %87 = vst.msk [vmem:[#allocation2] sm:$0xff] %vm86_vm0, %v84_v36 }
  0xa3   :  { %98 = dma.vmem_to_hbm [thread:$0]  %s94_s22, 128, %s96_s1, [#allocation3]  }
  0xa4   :  { %129 = dma.done.wait [#allocation3], 128  }
  0xa5   :  { %130 = vsyncadd [#allocation3], 4294967168 }
  0xa6   :  { %103 = vsyncpa [#allocation3], 1 }

</bundles_post_ra>
